<compile_context>
chip_gen: v6e
topology: v6e:2x2x1
jax: 0.10.0
libtpu: 0.0.40
codegen_flags: <defaults>
</compile_context>

<pallas_src>
import jax
import jax.numpy as jnp
from jax.experimental import pallas as pl
from jax.experimental.pallas import tpu as pltpu


def _round_up(x: int, m: int) -> int:
    return ((x + m - 1) // m) * m


# Default tile caps (elements).  Worst case (f32, double-buffered):
#   x: 256*1024*4*2 = 2 MiB, w: 1024*512*4*2 = 4 MiB, out: 256*512*4*2 = 1 MiB,
#   acc: 0.5 MiB  ->  ~8 MiB total, fits every generation's default VMEM limit.
_TM_MAX = 256
_TN_MAX = 512
_TK_MAX = 1024


def _linear_head_kernel(x_ref, w_ref, b_ref, o_ref, acc_ref):
    # x_ref: (TM, TK)  w_ref: (TK, TN)  b_ref: (1, TN)  o_ref: (TM, TN)
    # acc_ref: (TM, TN) f32 scratch, resident across the K grid axis.
    k = pl.program_id(2)

    @pl.when(k == 0)
    def _init():
        acc_ref[...] = jnp.zeros_like(acc_ref)

    acc_ref[...] += jnp.dot(
        x_ref[...], w_ref[...], preferred_element_type=jnp.float32
    )

    @pl.when(k == pl.num_programs(2) - 1)
    def _finalize():
        o_ref[...] = (acc_ref[...] + b_ref[...].astype(jnp.float32)).astype(
            o_ref.dtype
        )


def linear_head_forward(
    features,
    weight,
    bias,
    *,
    compute_dtype=None,          # e.g. jnp.bfloat16 to halve weight-streaming bytes
    out_dtype=jnp.float32,
    tm_max: int = _TM_MAX,
    tn_max: int = _TN_MAX,
    tk_max: int = _TK_MAX,
):
    """Equivalent of LinearHead.forward.

    features: (B, D) or (B, S, D).  If 3D, only the first token (CLS) is used.
    weight:   (D, L)   (transposed vs. PyTorch's (L, D) storage)
    bias:     (L,)
    returns:  {'logits': (B, L)}
    """
    if features.ndim == 3:
        # CLS-token slice, same semantics as PyTorch `features[:, 0, :]`.
        # TODO(synk): fold this slice into the x BlockSpec (3D block with a
        # squeezed size-1 seq dim) to avoid one extra HBM round trip of the
        # (B, D) slab; kept in the wrapper here for portability of the
        # second-minor block-shape constraint across Mosaic versions.
        x = features[:, 0, :]
    elif features.ndim == 2:
        x = features
    else:
        raise ValueError(f"unsupported features rank {features.ndim}")

    B, D = x.shape
    Dw, L = weight.shape
    if Dw != D:
        raise ValueError(f"weight shape {weight.shape} incompatible with D={D}")
    if bias.shape != (L,):
        raise ValueError(f"bias shape {bias.shape} incompatible with L={L}")

    if compute_dtype is not None:
        x = x.astype(compute_dtype)
        weight = weight.astype(compute_dtype)

    # ---- tile / padding selection ------------------------------------------
    # M (batch): single block if small (block == full dim satisfies tiling
    # rules), else 256-row tiles with zero-padded rows (sliced off after).
    if B <= tm_max:
        TM, B_pad = B, B
    else:
        TM = tm_max
        B_pad = _round_up(B, TM)

    # N (labels): always lane-dense -> pad to a multiple of 128.
    L128 = _round_up(L, 128)
    if L128 <= tn_max:
        TN, L_pad = L128, L128
    else:
        TN = tn_max
        L_pad = _round_up(L, TN)

    # K (embed dim): single block if it fits, else 1024-wide tiles with zero
    # padding (zeros contribute nothing to the accumulation).
    if D <= tk_max:
        TK, D_pad = D, D
    else:
        TK = tk_max
        D_pad = _round_up(D, TK)

    # ---- zero-pad operands where needed (no-ops when already aligned) -------
    if (B_pad, D_pad) != (B, D):
        x = jnp.pad(x, ((0, B_pad - B), (0, D_pad - D)))
    if (D_pad, L_pad) != (D, L):
        weight = jnp.pad(weight, ((0, D_pad - D), (0, L_pad - L)))
    b_padded = bias if L_pad == L else jnp.pad(bias, (0, L_pad - L))
    b2d = b_padded.reshape(1, L_pad)

    grid = (B_pad // TM, L_pad // TN, D_pad // TK)

    out = pl.pallas_call(
        _linear_head_kernel,
        out_shape=jax.ShapeDtypeStruct((B_pad, L_pad), out_dtype),
        grid=grid,
        in_specs=[
            pl.BlockSpec((TM, TK), lambda i, j, k: (i, k)),   # x
            pl.BlockSpec((TK, TN), lambda i, j, k: (k, j)),   # weight
            pl.BlockSpec((1, TN), lambda i, j, k: (0, j)),    # bias (L-tiled)
        ],
        out_specs=pl.BlockSpec((TM, TN), lambda i, j, k: (i, j)),
        scratch_shapes=[pltpu.VMEM((TM, TN), jnp.float32)],
        compiler_params=pltpu.CompilerParams(
            dimension_semantics=("parallel", "parallel", "arbitrary"),
        ),
    )(x, weight, b2d)

    logits = out[:B, :L]
    return {"logits": logits}


if __name__ == "__main__":
    # Small shapes consistent with the module: batch=2, seq=8, embed_dim=32, num_labels=10
    B, S, D, L = 2, 8, 32, 10

    key = jax.random.PRNGKey(0)
    k_feat, k_w, k_b = jax.random.split(key, 3)

    # deterministic synthetic parameters (nn.Linear(embed_dim, num_labels) shapes)
    bound = 1.0 / (D ** 0.5)
    weight = jax.random.uniform(k_w, (D, L), jnp.float32, -bound, bound)  # (embed_dim, num_labels)
    bias = jax.random.uniform(k_b, (L,), jnp.float32, -bound, bound)

    # 3D features path: logits = classifier(features[:, 0, :])
    features_3d = jax.random.normal(k_feat, (B, S, D), jnp.float32)
    out3 = linear_head_forward(features_3d, weight, bias)
    logits3 = jax.block_until_ready(out3["logits"])

    # 2D features path: logits = classifier(features)
    features_2d = features_3d[:, 0, :]
    out2 = linear_head_forward(features_2d, weight, bias)
    logits2 = jax.block_until_ready(out2["logits"])

    # sanity: kernel output matches a plain-JAX reference
    ref = features_2d @ weight + bias
    assert logits3.shape == (B, L)
    assert logits2.shape == (B, L)
    assert jnp.allclose(logits3, ref, atol=1e-5)
    assert jnp.allclose(logits2, ref, atol=1e-5)

    # bf16 operand path (f32 accumulation) — looser tolerance
    out_bf16 = linear_head_forward(features_2d, weight, bias, compute_dtype=jnp.bfloat16)
    logits_bf16 = jax.block_until_ready(out_bf16["logits"])
    assert logits_bf16.shape == (B, L)
    assert jnp.allclose(logits_bf16, ref, atol=5e-2, rtol=5e-2)

    print("KERNEL_OK")
</pallas_src>

<mosaic_0001>
module attributes {stable_mosaic.version = 11 : i64} {
  func.func @_linear_head_kernel(%arg0: i32, %arg1: i32, %arg2: i32, %arg3: memref<2x32xf32, #tpu.memory_space<vmem>>, %arg4: memref<32x128xf32, #tpu.memory_space<vmem>>, %arg5: memref<1x128xf32, #tpu.memory_space<vmem>>, %arg6: memref<2x128xf32, #tpu.memory_space<vmem>>, %arg7: memref<2x128xf32, #tpu.memory_space<vmem>>) attributes {dimension_semantics = [#tpu.dimension_semantics<parallel>, #tpu.dimension_semantics<parallel>, #tpu.dimension_semantics<arbitrary>], iteration_bounds = array<i64: 1, 1, 1>, scalar_prefetch = 0 : i64, scratch_operands = 1 : i64, tpu.core_type = #tpu.core_type<tc>, window_params = [{transform_indices = @transform_0, window_bounds = array<i64: 2, 32>}, {transform_indices = @transform_1, window_bounds = array<i64: 32, 128>}, {transform_indices = @transform_2, window_bounds = array<i64: 1, 128>}, {transform_indices = @transform_3, window_bounds = array<i64: 2, 128>}]} {
    %c0_i32 = arith.constant 0 : i32
    %0 = arith.cmpi eq, %arg2, %c0_i32 : i32
    %1 = arith.extui %0 : i1 to i32
    %c0_i32_0 = arith.constant 0 : i32
    %2 = arith.cmpi ne, %1, %c0_i32_0 : i32
    scf.if %2 {
      %cst_10 = arith.constant 0.000000e+00 : f32
      %12 = vector.broadcast %cst_10 : f32 to vector<2x128xf32>
      %c0_11 = arith.constant 0 : index
      %c0_12 = arith.constant 0 : index
      %13 = vector.load %arg7[%c0_11, %c0_12] : memref<2x128xf32, #tpu.memory_space<vmem>>, vector<2x128xf32>
      tpu.vector_store %arg7[%c0_11, %c0_12], %12 {strides = array<i32>} : memref<2x128xf32, #tpu.memory_space<vmem>>, vector<2x128xf32>,
    } else {
    }
    %c0 = arith.constant 0 : index
    %c0_1 = arith.constant 0 : index
    %3 = vector.load %arg7[%c0, %c0_1] : memref<2x128xf32, #tpu.memory_space<vmem>>, vector<2x128xf32>
    %c0_2 = arith.constant 0 : index
    %c0_3 = arith.constant 0 : index
    %4 = vector.load %arg3[%c0_2, %c0_3] : memref<2x32xf32, #tpu.memory_space<vmem>>, vector<2x32xf32>
    %c0_4 = arith.constant 0 : index
    %c0_5 = arith.constant 0 : index
    %5 = vector.load %arg4[%c0_4, %c0_5] : memref<32x128xf32, #tpu.memory_space<vmem>>, vector<32x128xf32>
    %cst = arith.constant dense<0.000000e+00> : vector<2x128xf32>
    %6 = tpu.matmul %4, %5, %cst {dimension_numbers = #tpu.dot_dimension_numbers<[1], [0], [0], [1], [0, 0, 1, 1], [], []>} : vector<2x32xf32>, vector<32x128xf32>, vector<2x128xf32> -> vector<2x128xf32>
    %7 = arith.addf %3, %6 : vector<2x128xf32>
    %c0_6 = arith.constant 0 : index
    %c0_7 = arith.constant 0 : index
    %8 = vector.load %arg7[%c0_6, %c0_7] : memref<2x128xf32, #tpu.memory_space<vmem>>, vector<2x128xf32>
    tpu.vector_store %arg7[%c0_6, %c0_7], %7 {strides = array<i32>} : memref<2x128xf32, #tpu.memory_space<vmem>>, vector<2x128xf32>,
    %c0_i32_8 = arith.constant 0 : i32
    %9 = arith.cmpi eq, %arg2, %c0_i32_8 : i32
    %10 = arith.extui %9 : i1 to i32
    %c0_i32_9 = arith.constant 0 : i32
    %11 = arith.cmpi ne, %10, %c0_i32_9 : i32
    scf.if %11 {
      %c0_10 = arith.constant 0 : index
      %c0_11 = arith.constant 0 : index
      %12 = vector.load %arg7[%c0_10, %c0_11] : memref<2x128xf32, #tpu.memory_space<vmem>>, vector<2x128xf32>
      %c0_12 = arith.constant 0 : index
      %c0_13 = arith.constant 0 : index
      %13 = vector.load %arg5[%c0_12, %c0_13] : memref<1x128xf32, #tpu.memory_space<vmem>>, vector<1x128xf32>
      %14 = vector.broadcast %13 : vector<1x128xf32> to vector<2x128xf32>
      %15 = arith.addf %12, %14 : vector<2x128xf32>
      %c0_14 = arith.constant 0 : index
      %c0_15 = arith.constant 0 : index
      %16 = vector.load %arg6[%c0_14, %c0_15] : memref<2x128xf32, #tpu.memory_space<vmem>>, vector<2x128xf32>
      tpu.vector_store %arg6[%c0_14, %c0_15], %15 {strides = array<i32>} : memref<2x128xf32, #tpu.memory_space<vmem>>, vector<2x128xf32>,
    } else {
    }
    return
  }
  func.func @transform_0(%arg0: i32, %arg1: i32, %arg2: i32) -> (i32, i32) {
    %c0_i32 = arith.constant 0 : i32
    return %arg0, %arg2 : i32, i32
  }
  func.func @transform_1(%arg0: i32, %arg1: i32, %arg2: i32) -> (i32, i32) {
    %c0_i32 = arith.constant 0 : i32
    return %arg2, %arg1 : i32, i32
  }
  func.func @transform_2(%arg0: i32, %arg1: i32, %arg2: i32) -> (i32, i32) {
    %c0_i32 = arith.constant 0 : i32
    %c0_i32_0 = arith.constant 0 : i32
    return %c0_i32, %arg1 : i32, i32
  }
  func.func @transform_3(%arg0: i32, %arg1: i32, %arg2: i32) -> (i32, i32) {
    %c0_i32 = arith.constant 0 : i32
    return %arg0, %arg1 : i32, i32
  }
}

</mosaic_0001>

<bundles_post_ra>
// kernel: tpu_custom_call.1
= control target key start
LH: loop header
LB: loop body
LE: loop exit
PB: predicated region body
PF: predicated region fallthrough
CT: control target
= control target key end

     0   :  { %8 = vsyncpa [#allocation4], 0  ;;  %s287_s0 = inlined_call_operand.hbm [shape: f32[2,32], index: 0, kind: input, shape index: {}]   ;;  %s288_s1 = inlined_call_operand.hbm [shape: f32[32,128], index: 1, kind: input, shape index: {}]   ;;  %s289_s2 = inlined_call_operand.vmem [shape: f32[1,128], index: 2, kind: input, shape index: {}]   ;;  %s290_s3 = inlined_call_operand.hbm [shape: f32[2,128], index: 3, kind: output, shape index: {}]  }
   0x1   :  { %9 = vsyncpa [#allocation7], 0 }
   0x2   :  { %10 = vsyncpa [#allocation5], 0  ;;  %s248_s12 = smov [#allocation3]   ;;  %s249_s14 = smov [#allocation6]  }
   0x3   :  { %s17_s13 = sshll.u32 %s248_s12, 4  ;;  %s26_s15 = sshll.u32 %s249_s14, 4  ;;  %s18_s13 = int_to_ptr.vmem [resolvable:$true] %s17_s13  ;;  %s27_s15 = int_to_ptr.vmem [resolvable:$true] %s26_s15 }
   0x4   :  { %s190_s16 = scalar_lea.vmem %s18_s13, 32  ;;  %p195_p1 = scmp.lt.s32.totalorder %s18_s13, %s18_s13 }
   0x5   :  { %p191_p0 = scmp.ne.s32.totalorder %s18_s13, %s190_s16  ;;  %p196_p2 = scmp.lt.s32.totalorder %s190_s16, %s190_s16 }
   0x7   :  { %p197_p3 = por %p196_p2, %p195_p1 }
   0x9   :  { %p198_p4 = pnand %p197_p3, %p191_p0 }
   0xb   :  { %201 = shalt.err (!%p198_p4)
}
   0xc   :  { %20 = dma.hbm_to_vmem [thread:$0]  %s287_s0, 32, %s18_s13, [#allocation4]  }
   0xd   :  { %s210_s19 = scalar_lea.vmem %s27_s15, 512  ;;  %p215_p6 = scmp.lt.s32.totalorder %s27_s15, %s27_s15 }
   0xe   :  { %p211_p5 = scmp.ne.s32.totalorder %s27_s15, %s210_s19  ;;  %p216_p7 = scmp.lt.s32.totalorder %s210_s19, %s210_s19 }
  0x10   :  { %p217_p8 = por %p216_p7, %p215_p6 }
  0x12   :  { %p218_p9 = pnand %p217_p8, %p211_p5 }
  0x14   :  { %221 = shalt.err (!%p218_p9)
}
  0x15   :  { %s250_s20 = smov 128   ;;  %s251_s21 = smov 8  }
  0x16   :  { %32 = dma.hbm_to_vmem [thread:$0]  %s288_s1, 512, %s27_s15, [#allocation7], %s250_s20, %s250_s20, %s251_s21  }
  0x17   :  { %242 = dma.done.wait [#allocation4], 32  }
  0x18   :  { %243 = vsyncadd [#allocation4], 4294967264 }
  0x19   :  { %244 = dma.done.wait [#allocation7], 512  }
  0x1a   :  { %245 = vsyncadd [#allocation7], 4294966784  ;;  %v252_v0 = vmov 0.0   ;;  %vm253_vm0 = vmmov 0   ;;  %v51_v1 = vld [vmem:[#allocation6 + $0x18] sm:$0xff]  ;;  %v50_v2 = vld [vmem:[#allocation6 + $0x10] sm:$0xff] }
  0x1b   :  { %164 = vmatprep.subr.mxu0 %v252_v0  ;;  %45 = vst [vmem:[#allocation2] sm:$0x3] %v252_v0  ;;  %172 = vmatprep.mubr.msk.f32.mxu0 %vm253_vm0, %v252_v0  ;;  %v49_v3 = vld [vmem:[#allocation6 + $0x8] sm:$0xff]  ;;  %v48_v4 = vld [vmem:[#allocation6] sm:$0xff]  ;;  %v47_v5 = vld [vmem:[#allocation3] sm:$0x3] }
  0x1c   :  { %165 = vmatpush3.msra.mxu0 %v51_v1  ;;  %vm52_vm1 = vcmask 261120   ;;  %v158_v10 = vld [vmem:[%s289_s2] ss:$0 sm:$0xff]  ;;  %s254_s24 = smov [#allocation8]  }
  0x1d   :  { %166 = vmatprep.subr.mxu0 %v252_v0  ;;  %s147_s25 = sshll.u32 %s254_s24, 4  ;;  %s148_s25 = int_to_ptr.vmem [resolvable:$true] %s147_s25 }
  0x1e   :  { %167 = vmatpush3.msra.mxu0 %v50_v2  ;;  %s222_s26 = scalar_lea.vmem %s148_s25, 32  ;;  %p227_p11 = scmp.lt.s32.totalorder %s148_s25, %s148_s25 }
  0x1f   :  { %168 = vmatprep.subr.mxu0 %v252_v0  ;;  %p223_p10 = scmp.ne.s32.totalorder %s148_s25, %s222_s26  ;;  %p228_p12 = scmp.lt.s32.totalorder %s222_s26, %s222_s26 }
  0x20   :  { %169 = vmatpush3.msra.mxu0 %v49_v3 }
  0x21   :  { %170 = vmatprep.subr.mxu0 %v252_v0  ;;  %p229_p13 = por %p228_p12, %p227_p11 }
  0x22   :  { %171 = vmatpush3.msra.mxu0 %v48_v4  ;;  %v46_v6 = vld [vmem:[#allocation2] sm:$0x3] }
  0x23   :  { %173 = vmatmul.mubr.msk.f32.vlgmr.msra.gmra.mxu0 %vm52_vm1, %v47_v5  ;;  %p230_p0 = pnand %p229_p13, %p223_p10 }
  0xe3   :  { %v122_v7 = vpop.f32.mrf.mxu0 }
  0xe4   :  { %v126_v8 = vadd.f32 %v122_v7, %v46_v6 }
  0xe5   :  { %v174_v9 = vpop.f32.mrf.mxu0 }
  0xe6   :  { %127 = vst [vmem:[#allocation2] sm:$0x3] %v126_v8 }
  0xed   :  { %v131_v11 = vld [vmem:[#allocation2] sm:$0x3] }
  0xee   :  { %v139_v12 = vadd.f32 %v158_v10, %v131_v11 }
  0xf0   :  { %140 = vst [vmem:[#allocation8] sm:$0x3] %v139_v12 }
  0xf1   :  { %233 = shalt.err (!%p230_p0)
}
  0xf2   :  { %150 = dma.vmem_to_hbm [thread:$0]  %s148_s25, 32, %s290_s3, [#allocation5]  }
  0xf3   :  { %246 = dma.done.wait [#allocation5], 32  }
  0xf4   :  { %247 = vsyncadd [#allocation5], 4294967264 }
  0xf5   :  { %154 = vsyncpa [#allocation4], 1 }
  0xf6   :  { %155 = vsyncpa [#allocation7], 1 }
  0xf7   :  { %156 = vsyncpa [#allocation5], 1 }

</bundles_post_ra>
